<compile_context>
chip_gen: v7x
topology: tpu7x:2x2x1
jax: 0.10.0
libtpu: 0.0.40
codegen_flags: <defaults>
</compile_context>

<pallas_src>
import functools

import jax
import jax.numpy as jnp
from jax.experimental import pallas as pl
from jax.experimental.pallas import tpu as pltpu


NUM_CLASSES = 100


def _round_up(x, m):
    return ((x + m - 1) // m) * m


def fused_classifier_kernel(x_ref, w_ref, b_ref, hw_ref, hb_ref, o_ref, *,
                            tb, p):
    """One block of `tb` images per grid step.

    x_ref : (tb*p, Kp)     im2col patches (bf16); p = H*W, Kp = pad(9*Cin, 128)
    w_ref : (Kp, Coutp)    conv weights in im2col layout, channels padded (bf16)
    b_ref : (1, Coutp)     conv bias, zero-padded (f32)
    hw_ref: (Coutp, NCp)   head weights, rows+classes padded to 128 (bf16)
    hb_ref: (1, NCp)       head bias, zero-padded (f32)
    o_ref : (1, tb, NCp)   output logits for this batch block (f32)
    """
    coutp = w_ref.shape[1]

    # Single lane-dense im2col matmul on the MXU: (tb*p, Kp) @ (Kp, Coutp).
    acc = jnp.dot(x_ref[...], w_ref[...], preferred_element_type=jnp.float32)

    # Conv bias + ReLU in f32 on the VPU (full 128-lane vregs, no masking).
    acc = jnp.maximum(acc + b_ref[...], 0.0)

    # Global average pool over the p spatial positions -> (tb, Coutp).
    pooled = jnp.mean(acc.reshape(tb, p, coutp), axis=1)

    # Classifier head: (tb, Coutp) @ (Coutp, NCp), both axes lane-dense.
    logits = jnp.dot(pooled.astype(hw_ref.dtype), hw_ref[...],
                     preferred_element_type=jnp.float32) + hb_ref[...]

    o_ref[...] = logits.reshape(o_ref.shape).astype(o_ref.dtype)


def base_model_forward(x_nchw, params, *, batch_block=None):
    """x_nchw: (B, Cin, H, W) float32 -> logits (B, NUM_CLASSES)."""
    conv_w, conv_b, head_w, head_b = params
    B, Cin, H, W = x_nchw.shape
    Cout = conv_w.shape[3]
    num_classes = head_w.shape[1]

    P = H * W
    K = 9 * Cin
    Kp = _round_up(K, 128)              # lane-dense contraction axis
    Coutp = _round_up(Cout, 128)        # lane-dense hidden/channel axis
    NCp = _round_up(num_classes, 128)   # lane-dense class axis

    if batch_block is None:
        # Keep >=2 grid steps when possible (megacore sharding), cap block at 8.
        batch_block = max(1, min(8, B // 2))
    TB = batch_block
    B_pad = _round_up(B, TB)
    NB = B_pad // TB

    # ---- im2col + layout plumbing (plain XLA, outside the kernel) ----
    x = jnp.transpose(x_nchw, (0, 2, 3, 1))                 # NCHW -> NHWC
    xp = jnp.pad(x, ((0, 0), (1, 1), (1, 1), (0, 0)))       # spatial pad 1
    taps = [xp[:, ky:ky + H, kx:kx + W, :]
            for ky in range(3) for kx in range(3)]
    patches = jnp.concatenate(taps, axis=-1).reshape(B, P, K)
    patches = jnp.pad(patches, ((0, B_pad - B), (0, 0), (0, Kp - K)))
    patches = patches.reshape(B_pad * P, Kp).astype(jnp.bfloat16)

    # Conv weights (3,3,Cin,Cout) -> (9*Cin, Cout) in the same tap order,
    # zero-padded along K and the channel axis; head padded along both axes
    # (padded channel rows are zero, so padded channels contribute nothing).
    w_flat = conv_w.reshape(K, Cout)
    w_flat = jnp.pad(w_flat, ((0, Kp - K), (0, Coutp - Cout)))
    w_flat = w_flat.astype(jnp.bfloat16)
    b_conv = jnp.pad(conv_b.reshape(1, Cout),
                     ((0, 0), (0, Coutp - Cout))).astype(jnp.float32)
    hw = jnp.pad(head_w, ((0, Coutp - Cout),
                          (0, NCp - num_classes))).astype(jnp.bfloat16)
    hb = jnp.pad(head_b.reshape(1, num_classes),
                 ((0, 0), (0, NCp - num_classes))).astype(jnp.float32)

    cost = pl.CostEstimate(
        flops=2 * B_pad * P * Kp * Coutp + 2 * B_pad * Coutp * NCp,
        transcendentals=0,
        bytes_accessed=(patches.size * 2 + w_flat.size * 2 + hw.size * 2
                        + b_conv.size * 4 + hb.size * 4 + NB * TB * NCp * 4),
    )

    kernel = functools.partial(fused_classifier_kernel, tb=TB, p=P)

    out = pl.pallas_call(
        kernel,
        out_shape=jax.ShapeDtypeStruct((NB, TB, NCp), jnp.float32),
        grid=(NB,),
        in_specs=[
            pl.BlockSpec((TB * P, Kp), lambda b: (b, 0)),
            pl.BlockSpec((Kp, Coutp), lambda b: (0, 0)),
            pl.BlockSpec((1, Coutp), lambda b: (0, 0)),
            pl.BlockSpec((Coutp, NCp), lambda b: (0, 0)),
            pl.BlockSpec((1, NCp), lambda b: (0, 0)),
        ],
        out_specs=pl.BlockSpec((1, TB, NCp), lambda b: (b, 0, 0)),
        compiler_params=pltpu.CompilerParams(
            dimension_semantics=("parallel",),
            vmem_limit_bytes=32 * 1024 * 1024),
        cost_estimate=cost,
    )(patches, w_flat, b_conv, hw, hb)

    return out.reshape(B_pad, NCp)[:B, :num_classes]


def init_params(key, in_channels, hidden, num_classes):
    k1, k2, k3, k4 = jax.random.split(key, 4)
    conv_w = jax.random.normal(k1, (3, 3, in_channels, hidden),
                               jnp.float32) * 0.05
    conv_b = jax.random.normal(k2, (1, hidden), jnp.float32) * 0.01
    head_w = jax.random.normal(k3, (hidden, num_classes), jnp.float32) * 0.05
    head_b = jax.random.normal(k4, (1, num_classes), jnp.float32) * 0.01
    return conv_w, conv_b, head_w, head_b


if __name__ == "__main__":
    B, Cin, H, W = 2, 4, 16, 16
    HIDDEN = 32

    key = jax.random.PRNGKey(0)
    kx, kp = jax.random.split(key)
    x = jax.random.normal(kx, (B, Cin, H, W), jnp.float32)
    params = init_params(kp, Cin, HIDDEN, NUM_CLASSES)

    fwd = jax.jit(base_model_forward)
    logits = fwd(x, params)
    jax.block_until_ready(logits)
    assert logits.shape == (B, NUM_CLASSES), logits.shape
    assert bool(jnp.all(jnp.isfinite(logits)))
    print("KERNEL_OK")
</pallas_src>

<mosaic_0001>
module attributes {stable_mosaic.version = 11 : i64} {
  func.func @fused_classifier_kernel(%arg0: i32, %arg1: memref<256x128xbf16, #tpu.memory_space<vmem>>, %arg2: memref<128x128xbf16, #tpu.memory_space<vmem>>, %arg3: memref<1x128xf32, #tpu.memory_space<vmem>>, %arg4: memref<128x128xbf16, #tpu.memory_space<vmem>>, %arg5: memref<1x128xf32, #tpu.memory_space<vmem>>, %arg6: memref<1x1x128xf32, #tpu.memory_space<vmem>>) attributes {dimension_semantics = [#tpu.dimension_semantics<parallel>], iteration_bounds = array<i64: 2>, scalar_prefetch = 0 : i64, scratch_operands = 0 : i64, tpu.core_type = #tpu.core_type<tc>, window_params = [{transform_indices = @transform_0, window_bounds = array<i64: 256, 128>}, {pipeline_mode = #tpu.pipeline_mode<synchronous>, transform_indices = @transform_1, window_bounds = array<i64: 128, 128>}, {pipeline_mode = #tpu.pipeline_mode<synchronous>, transform_indices = @transform_2, window_bounds = array<i64: 1, 128>}, {pipeline_mode = #tpu.pipeline_mode<synchronous>, transform_indices = @transform_3, window_bounds = array<i64: 128, 128>}, {pipeline_mode = #tpu.pipeline_mode<synchronous>, transform_indices = @transform_4, window_bounds = array<i64: 1, 128>}, {transform_indices = @transform_5, window_bounds = array<i64: 1, 1, 128>}]} {
    %c0 = arith.constant 0 : index
    %c0_0 = arith.constant 0 : index
    %0 = vector.load %arg1[%c0, %c0_0] : memref<256x128xbf16, #tpu.memory_space<vmem>>, vector<256x128xbf16>
    %c0_1 = arith.constant 0 : index
    %c0_2 = arith.constant 0 : index
    %1 = vector.load %arg2[%c0_1, %c0_2] : memref<128x128xbf16, #tpu.memory_space<vmem>>, vector<128x128xbf16>
    %cst = arith.constant dense<0.000000e+00> : vector<256x128xf32>
    %2 = tpu.matmul %0, %1, %cst {dimension_numbers = #tpu.dot_dimension_numbers<[1], [0], [0], [1], [0, 0, 1, 1], [], []>} : vector<256x128xbf16>, vector<128x128xbf16>, vector<256x128xf32> -> vector<256x128xf32>
    %c0_3 = arith.constant 0 : index
    %c0_4 = arith.constant 0 : index
    %3 = vector.load %arg3[%c0_3, %c0_4] : memref<1x128xf32, #tpu.memory_space<vmem>>, vector<1x128xf32>
    %4 = vector.broadcast %3 : vector<1x128xf32> to vector<256x128xf32>
    %5 = arith.addf %2, %4 : vector<256x128xf32>
    %cst_5 = arith.constant 0.000000e+00 : f32
    %6 = vector.broadcast %cst_5 : f32 to vector<256x128xf32>
    %7 = arith.maximumf %5, %6 : vector<256x128xf32>
    %8 = vector.shape_cast %7 : vector<256x128xf32> to vector<1x256x128xf32>
    %cst_6 = arith.constant dense<0.000000e+00> : vector<1x128xf32>
    %9 = vector.multi_reduction <add>, %8, %cst_6 [1] : vector<1x256x128xf32> to vector<1x128xf32>
    %cst_7 = arith.constant 2.560000e+02 : f32
    %10 = vector.broadcast %cst_7 : f32 to vector<1x128xf32>
    %11 = arith.divf %9, %10 : vector<1x128xf32>
    %12 = arith.truncf %11 : vector<1x128xf32> to vector<1x128xbf16>
    %c0_8 = arith.constant 0 : index
    %c0_9 = arith.constant 0 : index
    %13 = vector.load %arg4[%c0_8, %c0_9] : memref<128x128xbf16, #tpu.memory_space<vmem>>, vector<128x128xbf16>
    %cst_10 = arith.constant dense<0.000000e+00> : vector<1x128xf32>
    %14 = tpu.matmul %12, %13, %cst_10 {dimension_numbers = #tpu.dot_dimension_numbers<[1], [0], [0], [1], [0, 0, 1, 1], [], []>} : vector<1x128xbf16>, vector<128x128xbf16>, vector<1x128xf32> -> vector<1x128xf32>
    %c0_11 = arith.constant 0 : index
    %c0_12 = arith.constant 0 : index
    %15 = vector.load %arg5[%c0_11, %c0_12] : memref<1x128xf32, #tpu.memory_space<vmem>>, vector<1x128xf32>
    %16 = arith.addf %14, %15 : vector<1x128xf32>
    %17 = vector.shape_cast %16 : vector<1x128xf32> to vector<1x1x128xf32>
    %c0_13 = arith.constant 0 : index
    %c0_14 = arith.constant 0 : index
    %c0_15 = arith.constant 0 : index
    %18 = vector.load %arg6[%c0_13, %c0_14, %c0_15] : memref<1x1x128xf32, #tpu.memory_space<vmem>>, vector<1x1x128xf32>
    tpu.vector_store %arg6[%c0_13, %c0_14, %c0_15], %17 {strides = array<i32>} : memref<1x1x128xf32, #tpu.memory_space<vmem>>, vector<1x1x128xf32>,
    return
  }
  func.func @transform_0(%arg0: i32) -> (i32, i32) {
    %c0_i32 = arith.constant 0 : i32
    %c0_i32_0 = arith.constant 0 : i32
    return %arg0, %c0_i32 : i32, i32
  }
  func.func @transform_1(%arg0: i32) -> (i32, i32) {
    %c0_i32 = arith.constant 0 : i32
    %c0_i32_0 = arith.constant 0 : i32
    %c0_i32_1 = arith.constant 0 : i32
    return %c0_i32, %c0_i32_0 : i32, i32
  }
  func.func @transform_2(%arg0: i32) -> (i32, i32) {
    %c0_i32 = arith.constant 0 : i32
    %c0_i32_0 = arith.constant 0 : i32
    %c0_i32_1 = arith.constant 0 : i32
    return %c0_i32, %c0_i32_0 : i32, i32
  }
  func.func @transform_3(%arg0: i32) -> (i32, i32) {
    %c0_i32 = arith.constant 0 : i32
    %c0_i32_0 = arith.constant 0 : i32
    %c0_i32_1 = arith.constant 0 : i32
    return %c0_i32, %c0_i32_0 : i32, i32
  }
  func.func @transform_4(%arg0: i32) -> (i32, i32) {
    %c0_i32 = arith.constant 0 : i32
    %c0_i32_0 = arith.constant 0 : i32
    %c0_i32_1 = arith.constant 0 : i32
    return %c0_i32, %c0_i32_0 : i32, i32
  }
  func.func @transform_5(%arg0: i32) -> (i32, i32, i32) {
    %c0_i32 = arith.constant 0 : i32
    %c0_i32_0 = arith.constant 0 : i32
    %c0_i32_1 = arith.constant 0 : i32
    return %arg0, %c0_i32, %c0_i32_0 : i32, i32, i32
  }
}

</mosaic_0001>

<bundles_post_ra>
// kernel: base_model_forward.1
= control target key start
LH: loop header
LB: loop body
LE: loop exit
PB: predicated region body
PF: predicated region fallthrough
CT: control target
= control target key end

     0   :  { %10 = vsyncpa [#allocation3], 0  ;;  %s1349_s0 = inlined_call_operand.vmem [shape: bf16[512,128], index: 0, kind: input, shape index: {}]   ;;  %s1350_s1 = inlined_call_operand.vmem [shape: bf16[128,128], index: 1, kind: input, shape index: {}]   ;;  %s1351_s2 = inlined_call_operand.vmem [shape: f32[1,128], index: 2, kind: input, shape index: {}]   ;;  %s1352_s3 = inlined_call_operand.vmem [shape: bf16[128,128], index: 3, kind: input, shape index: {}]   ;;  %s1353_s4 = inlined_call_operand.vmem [shape: f32[1,128], index: 4, kind: input, shape index: {}]   ;;  %s1354_s5 = inlined_call_operand.hbm [shape: f32[2,1,128], index: 5, kind: output, shape index: {}]  }
   0x1   :  { %12 = vsyncpa [#allocation3 + $0x1], 0  ;;  %s1144_s18 = smov 0   ;;  %s1146_s19 = smov 0  }
   0x2   :  { %s1148_s20 = smov 0   ;;  %s1150_s21 = smov 0  }
   0x3 LB: > { %s1165_s22 = sadd.s32 4294967295, %s1109_s21   ;;  %s831_s23 = sadd.s32 4294967294, %s1109_s21   ;;  %s1109_s21 = sphi %s1150_s21, %s1360_s21   ;;  %s1105_s20 = sphi %s1148_s20, %s1359_s20   ;;  %s1101_s19 = sphi %s1146_s19, %s1358_s19   ;;  %s1097_s18 = sphi %s1144_s18, %s1357_s18  }
   0x4   : > { %s1169_s24 = sadd.s32 1, %s1109_s21   ;;  %s135_s25 = sadd.s32 1, %s1105_s20 }
   0x5   : > { %s132_s26 = ssub.s32 %s1109_s21, %s1169_s24  ;;  %p145_p0 = scmp.ne.s32.totalorder %s1105_s20, %s1101_s19 }
   0x6   : > { %p133_p1 = scmp.eq.s32.totalorder %s132_s26, 0  ;;  %p146_p2 = scmp.eq.s32.totalorder %s1165_s22, 1 }
   0x7   : > { %p151_p3 = scmp.ne.s32.totalorder %s1101_s19, %s1097_s18  ;;  %p152_p4 = scmp.eq.s32.totalorder %s831_s23, 1 }
   0x8   : > { %s1180_s27 = scalar_select %p133_p1, %s1105_s20, %s135_s25  }
   0x9   : > { %p1182_p5 = por %p146_p2, %p145_p0  ;;  %p1186_p6 = por %p152_p4, %p151_p3 }
   0xa   : > { %p834_p7 = scmp.ge.s32.totalorder %s1109_s21, 1  ;;  %p191_p8 = scmp.lt.s32.totalorder %s1109_s21, 3 }
   0xc   : > { %p192_p9 = pnand %p834_p7, %p191_p8 }
   0xd   : > { %v1015_v0 = vld [vmem:[%s1350_s1] sm:$0xff] (!%p192_p9)   ;;  %s835_s7 = sshll.u32 (!%p192_p9), %s1165_s22, 5  ;;  %v1016_v1 = vld [vmem:[%s1350_s1 + $0x8] sm:$0xff] (!%p192_p9)   ;;  %v1017_v2 = vld [vmem:[%s1350_s1 + $0x10] sm:$0xff] (!%p192_p9)   ;;  %v1111_v25 = vmov (!%p192_p9), 0.0   ;;  %vm1112_vm0 = vmmov (!%p192_p9), 0  }
   0xe   : > { %195 = sbr.rel (%p192_p9) target bundleno = 571 (0x23b), region = 40  ;;  %p219_p10 = scmp.lt.s32.totalorder (!%p192_p9), %s835_s7, 63  ;;  %906 = vmatprep.subr.bf16.mxu0 (!%p192_p9), %v1015_v0  ;;  %v1018_v3 = vld [vmem:[%s1350_s1 + $0x18] sm:$0xff] (!%p192_p9)   ;;  %v1019_v5 = vld [vmem:[%s1350_s1 + $0x20] sm:$0xff] (!%p192_p9)   ;;  %v1020_v6 = vld [vmem:[%s1350_s1 + $0x28] sm:$0xff] (!%p192_p9)   ;;  %954 = vmatprep.subr.bf16.mxu1 (!%p192_p9), %v1111_v25 }
   0xf   : > { %907 = vmatpush3.bf16.msra.mxu0 (!%p192_p9), %v1015_v0  ;;  %v1021_v7 = vld [vmem:[%s1350_s1 + $0x30] sm:$0xff] (!%p192_p9)   ;;  %v1022_v8 = vld [vmem:[%s1350_s1 + $0x38] sm:$0xff] (!%p192_p9)   ;;  %v1039_v24 = vld [vmem:[%s1352_s3] sm:$0xff] (!%p192_p9)   ;;  %970 = vmatprep.mubr.msk.bf16.mxu1 (!%p192_p9), %vm1112_vm0, %v1111_v25  ;;  %s870_s16 = sshll.u32 (!%p192_p9), %s1165_s22, 4  ;;  %s1113_s6 = smov (!%p192_p9), [#allocation2]  }
  0x10   : > { %908 = vmatprep.subr.bf16.mxu0 (!%p192_p9), %v1016_v1  ;;  %955 = vmatpush3.bf16.msra.mxu1 (!%p192_p9), %v1039_v24  ;;  %v1040_v26 = vld [vmem:[%s1352_s3 + $0x8] sm:$0xff] (!%p192_p9)   ;;  %v1041_v27 = vld [vmem:[%s1352_s3 + $0x10] sm:$0xff] (!%p192_p9)   ;;  %v1042_v28 = vld [vmem:[%s1352_s3 + $0x18] sm:$0xff] (!%p192_p9)   ;;  %s1307_s26 = scalar_lea.hbm (!%p192_p9), %s1354_s5, %s870_s16 }
  0x11   : > { %956 = vmatprep.subr.bf16.mxu1 (!%p192_p9), %v1111_v25  ;;  %v1043_v29 = vld [vmem:[%s1352_s3 + $0x20] sm:$0xff] (!%p192_p9)   ;;  %v1044_v30 = vld [vmem:[%s1352_s3 + $0x28] sm:$0xff] (!%p192_p9)   ;;  %v1045_v31 = vld [vmem:[%s1352_s3 + $0x30] sm:$0xff] (!%p192_p9)  }
  0x12   : > { %v1046_v32 = vld [vmem:[%s1352_s3 + $0x38] sm:$0xff] (!%p192_p9)   ;;  %v1265_v33 = vld [vmem:[%s1351_s2] ss:$0 sm:$0xff] (!%p192_p9) }
  0x13   : > { %909 = vmatpush3.bf16.msra.mxu0 (!%p192_p9), %v1016_v1 }
  0x14   : > { %910 = vmatprep.subr.bf16.mxu0 (!%p192_p9), %v1017_v2  ;;  %957 = vmatpush3.bf16.msra.mxu1 (!%p192_p9), %v1040_v26 }
  0x15   : > { %s1362_s7 = smov (!%p219_p10, %s835_s7), 63  ;;  %958 = vmatprep.subr.bf16.mxu1 %v1111_v25 }
  0x16   : > { %s836_s12 = sshll.u32 %s1362_s7, 2  ;;  %s1051_s7 = sshll.u32 %s1113_s6, 4  ;;  %s1052_s7 = int_to_ptr.vmem [resolvable:$false] %s1051_s7 }
  0x17   : > { %s1205_s15 = scalar_lea.vmem %s1349_s0, %s836_s12  ;;  %911 = vmatpush3.bf16.msra.mxu0 %v1017_v2  ;;  %s216_s12 = sand.u32 1, %s1101_s19  }
  0x18   : > { %v1023_v4 = vld [vmem:[%s1205_s15] sm:$0xff]   ;;  %912 = vmatprep.subr.bf16.mxu0 %v1018_v3  ;;  %v1024_v9 = vld [vmem:[%s1205_s15 + $0x8] sm:$0xff]   ;;  %v1025_v10 = vld [vmem:[%s1205_s15 + $0x10] sm:$0xff]   ;;  %959 = vmatpush3.bf16.msra.mxu1 %v1041_v27  ;;  %s764_s30 = scalar_lea.sflag [#allocation3], %s216_s12  ;;  %s1053_s8 = scalar_lea.vmem %s1052_s7, 32 }
  0x19   : > { %922 = vmatprep.mubr.bf16.mxu0 %v1023_v4  ;;  %v1026_v11 = vld [vmem:[%s1205_s15 + $0x18] sm:$0xff]   ;;  %v1027_v12 = vld [vmem:[%s1205_s15 + $0x20] sm:$0xff]   ;;  %v1028_v13 = vld [vmem:[%s1205_s15 + $0x28] sm:$0xff]   ;;  %960 = vmatprep.subr.bf16.mxu1 %v1111_v25 }
  0x1a   : > { %v1029_v14 = vld [vmem:[%s1205_s15 + $0x30] sm:$0xff]   ;;  %v1030_v15 = vld [vmem:[%s1205_s15 + $0x38] sm:$0xff]   ;;  %v1031_v16 = vld [vmem:[%s1205_s15 + $0x40] sm:$0xff]  }
  0x1b   : > { %913 = vmatpush3.bf16.msra.mxu0 %v1018_v3  ;;  %v1032_v17 = vld [vmem:[%s1205_s15 + $0x48] sm:$0xff]   ;;  %v1033_v18 = vld [vmem:[%s1205_s15 + $0x50] sm:$0xff]   ;;  %v1034_v19 = vld [vmem:[%s1205_s15 + $0x58] sm:$0xff]  }
  0x1c   : > { %914 = vmatprep.subr.bf16.mxu0 %v1019_v5  ;;  %v1035_v20 = vld [vmem:[%s1205_s15 + $0x60] sm:$0xff]   ;;  %v1036_v21 = vld [vmem:[%s1205_s15 + $0x68] sm:$0xff]   ;;  %v1037_v22 = vld [vmem:[%s1205_s15 + $0x70] sm:$0xff]   ;;  %961 = vmatpush3.bf16.msra.mxu1 %v1042_v28 }
  0x1d   : > { %v1038_v23 = vld [vmem:[%s1205_s15 + $0x78] sm:$0xff]   ;;  %962 = vmatprep.subr.bf16.mxu1 %v1111_v25  ;;  %s217_s15 = scalar_lea.vmem [#allocation2], %s216_s12 }
  0x1e   : > { %s776_s17 = sshll.u32 %s217_s15, 4  ;;  %s1309_s17 = int_to_ptr.vmem [resolvable:$true] %s776_s17 }
  0x1f   : > { %915 = vmatpush3.bf16.msra.mxu0 %v1019_v5  ;;  %s1047_s22 = scalar_lea.vmem %s1309_s17, 16  ;;  %p1054_p0 = scmp.lt.s32.totalorder %s1309_s17, %s1052_s7 }
  0x20   : > { %916 = vmatprep.subr.bf16.mxu0 %v1020_v6  ;;  %963 = vmatpush3.bf16.msra.mxu1 %v1043_v29  ;;  %p1048_p11 = scmp.ne.s32.totalorder %s1309_s17, %s1047_s22  ;;  %p1055_p1 = scmp.lt.s32.totalorder %s1053_s8, %s1047_s22 }
  0x21   : > { %964 = vmatprep.subr.bf16.mxu1 %v1111_v25 }
  0x22   : > { %p1049_p12 = pnand %p1048_p11, %p1182_p5  ;;  %p1056_p2 = por %p1055_p1, %p1054_p0 }
  0x23   : > { %917 = vmatpush3.bf16.msra.mxu0 %v1020_v6 }
  0x24   : > { %918 = vmatprep.subr.bf16.mxu0 %v1021_v7  ;;  %965 = vmatpush3.bf16.msra.mxu1 %v1044_v30  ;;  %p1050_p13 = pneg %p1049_p12 }
  0x25   : > { %966 = vmatprep.subr.bf16.mxu1 %v1111_v25 }
  0x26   : > { %p1057_p3 = pnand %p1056_p2, %p1050_p13 }
  0x27   : > { %919 = vmatpush3.bf16.msra.mxu0 %v1021_v7 }
  0x28   : > { %920 = vmatprep.subr.bf16.mxu0 %v1022_v8  ;;  %967 = vmatpush3.bf16.msra.mxu1 %v1045_v31 }
  0x29   : > { %968 = vmatprep.subr.bf16.mxu1 %v1111_v25 }
  0x2b   : > { %921 = vmatpush3.bf16.msra.mxu0 %v1022_v8 }
  0x2c   : > { %969 = vmatpush3.bf16.msra.mxu1 %v1046_v32 }
  0x2e   : > { %923 = vmatmul.mubr.bf16.vlgmr.msra.gmra.mrb[0].mxu0 %v1024_v9 }
  0x2f   : > { %926 = vmatprep.mubr.bf16.mxu0 %v1025_v10 }
  0x36   : > { %927 = vmatmul.mubr.bf16.gmra.mrb[4].mxu0 %v1026_v11 }
  0x37   : > { %930 = vmatprep.mubr.bf16.mxu0 %v1027_v12 }
  0x3e   : > { %931 = vmatmul.mubr.bf16.gmra.mrb[8].mxu0 %v1028_v13 }
  0x3f   : > { %934 = vmatprep.mubr.bf16.mxu0 %v1029_v14 }
  0x46   : > { %935 = vmatmul.mubr.bf16.gmra.mrb[12].mxu0 %v1030_v15 }
  0x47   : > { %938 = vmatprep.mubr.bf16.mxu0 %v1031_v16 }
  0x4e   : > { %939 = vmatmul.mubr.bf16.gmra.mrb[16].mxu0 %v1032_v17 }
  0x4f   : > { %942 = vmatprep.mubr.bf16.mxu0 %v1033_v18 }
  0x56   : > { %943 = vmatmul.mubr.bf16.gmra.mrb[20].mxu0 %v1034_v19 }
  0x57   : > { %946 = vmatprep.mubr.bf16.mxu0 %v1035_v20 }
  0x5e   : > { %947 = vmatmul.mubr.bf16.gmra.mrb[24].mxu0 %v1036_v21 }
  0x5f   : > { %950 = vmatprep.mubr.bf16.mxu0 %v1037_v22 }
  0x66   : > { %951 = vmatmul.mubr.bf16.gmra.mrb[28].mxu0 %v1038_v23 }
 0x101   : > { %v924_v34 = vpop.f32.mrb[0].mxu0 }
 0x102   : > { %v458_v35 = vpop.f32.mrb[1].mxu0  ;;  %v467_v39 = vadd.f32 %v924_v34, %v1265_v33 }
 0x103   : > { %v459_v36 = vadd.f32 %v1265_v33, %v458_v35  ;;  %v925_v37 = vpop.f32.mrb[2].mxu0 }
 0x104   : > { %v461_v38 = vpop.f32.mrb[3].mxu0  ;;  %v470_v42 = vadd.f32 %v925_v37, %v1265_v33  ;;  %v587_v44 = vmax.f32 %v467_v39, 0.0 }
 0x105   : > { %v462_v40 = vadd.f32 %v1265_v33, %v461_v38  ;;  %v585_v41 = vmax.f32 %v459_v36, 0.0 }
 0x106   : > { %v588_v48 = vmax.f32 %v470_v42, 0.0 }
 0x107   : > { %v586_v43 = vmax.f32 %v462_v40, 0.0 }
 0x109   : > { %v617_v45 = vadd.f32 %v586_v43, %v585_v41  ;;  %v928_v46 = vpop.f32.mrb[4].mxu0 }
 0x10a   : > { %v474_v47 = vpop.f32.mrb[5].mxu0  ;;  %v483_v53 = vadd.f32 %v928_v46, %v1265_v33 }
 0x10b   : > { %v618_v49 = vadd.f32 %v617_v45, %v587_v44  ;;  %v475_v50 = vadd.f32 %v1265_v33, %v474_v47  ;;  %v929_v51 = vpop.f32.mrb[6].mxu0 }
 0x10c   : > { %v477_v52 = vpop.f32.mrb[7].mxu0  ;;  %v486_v58 = vadd.f32 %v929_v51, %v1265_v33  ;;  %v591_v60 = vmax.f32 %v483_v53, 0.0 }
 0x10d   : > { %v589_v54 = vmax.f32 %v475_v50, 0.0  ;;  %v619_v55 = vadd.f32 %v618_v49, %v588_v48  ;;  %v478_v56 = vadd.f32 %v1265_v33, %v477_v52 }
 0x10e   : > { %v592_v0 = vmax.f32 %v486_v58, 0.0 }
 0x10f   : > { %v620_v57 = vadd.f32 %v619_v55, %v589_v54  ;;  %v590_v59 = vmax.f32 %v478_v56, 0.0 }
 0x111   : > { %v621_v61 = vadd.f32 %v620_v57, %v590_v59  ;;  %v932_v62 = vpop.f32.mrb[8].mxu0 }
 0x112   : > { %v490_v63 = vpop.f32.mrb[9].mxu0  ;;  %v499_v5 = vadd.f32 %v932_v62, %v1265_v33 }
 0x113   : > { %v622_v1 = vadd.f32 %v621_v61, %v591_v60  ;;  %v491_v2 = vadd.f32 %v1265_v33, %v490_v63  ;;  %v933_v3 = vpop.f32.mrb[10].mxu0 }
 0x114   : > { %v493_v4 = vpop.f32.mrb[11].mxu0  ;;  %v502_v10 = vadd.f32 %v933_v3, %v1265_v33  ;;  %v595_v12 = vmax.f32 %v499_v5, 0.0 }
 0x115   : > { %v593_v6 = vmax.f32 %v491_v2, 0.0  ;;  %v623_v7 = vadd.f32 %v622_v1, %v592_v0  ;;  %v494_v8 = vadd.f32 %v1265_v33, %v493_v4 }
 0x116   : > { %v596_v16 = vmax.f32 %v502_v10, 0.0 }
 0x117   : > { %v624_v9 = vadd.f32 %v623_v7, %v593_v6  ;;  %v594_v11 = vmax.f32 %v494_v8, 0.0 }
 0x119   : > { %v625_v13 = vadd.f32 %v624_v9, %v594_v11  ;;  %v936_v14 = vpop.f32.mrb[12].mxu0 }
 0x11a   : > { %v506_v15 = vpop.f32.mrb[13].mxu0  ;;  %v515_v21 = vadd.f32 %v936_v14, %v1265_v33 }
 0x11b   : > { %v626_v17 = vadd.f32 %v625_v13, %v595_v12  ;;  %v507_v18 = vadd.f32 %v1265_v33, %v506_v15  ;;  %v937_v19 = vpop.f32.mrb[14].mxu0 }
 0x11c   : > { %v509_v20 = vpop.f32.mrb[15].mxu0  ;;  %v518_v26 = vadd.f32 %v937_v19, %v1265_v33  ;;  %v599_v28 = vmax.f32 %v515_v21, 0.0 }
 0x11d   : > { %v597_v22 = vmax.f32 %v507_v18, 0.0  ;;  %v627_v23 = vadd.f32 %v626_v17, %v596_v16  ;;  %v510_v24 = vadd.f32 %v1265_v33, %v509_v20 }
 0x11e   : > { %v600_v32 = vmax.f32 %v518_v26, 0.0 }
 0x11f   : > { %v628_v25 = vadd.f32 %v627_v23, %v597_v22  ;;  %v598_v27 = vmax.f32 %v510_v24, 0.0 }
 0x121   : > { %v629_v29 = vadd.f32 %v628_v25, %v598_v27  ;;  %v940_v30 = vpop.f32.mrb[16].mxu0 }
 0x122   : > { %v522_v31 = vpop.f32.mrb[17].mxu0  ;;  %v531_v38 = vadd.f32 %v940_v30, %v1265_v33 }
 0x123   : > { %v630_v34 = vadd.f32 %v629_v29, %v599_v28  ;;  %v523_v35 = vadd.f32 %v1265_v33, %v522_v31  ;;  %v941_v36 = vpop.f32.mrb[18].mxu0 }
 0x124   : > { %v525_v37 = vpop.f32.mrb[19].mxu0  ;;  %v534_v43 = vadd.f32 %v941_v36, %v1265_v33  ;;  %v603_v45 = vmax.f32 %v531_v38, 0.0 }
 0x125   : > { %v601_v39 = vmax.f32 %v523_v35, 0.0  ;;  %v631_v40 = vadd.f32 %v630_v34, %v600_v32  ;;  %v526_v41 = vadd.f32 %v1265_v33, %v525_v37 }
 0x126   : > { %v604_v49 = vmax.f32 %v534_v43, 0.0 }
 0x127   : > { %v632_v42 = vadd.f32 %v631_v40, %v601_v39  ;;  %v602_v44 = vmax.f32 %v526_v41, 0.0 }
 0x129   : > { %v633_v46 = vadd.f32 %v632_v42, %v602_v44  ;;  %v944_v47 = vpop.f32.mrb[20].mxu0 }
 0x12a   : > { %v538_v48 = vpop.f32.mrb[21].mxu0  ;;  %v547_v54 = vadd.f32 %v944_v47, %v1265_v33 }
 0x12b   : > { %v634_v50 = vadd.f32 %v633_v46, %v603_v45  ;;  %v539_v51 = vadd.f32 %v1265_v33, %v538_v48  ;;  %v945_v52 = vpop.f32.mrb[22].mxu0 }
 0x12c   : > { %v541_v53 = vpop.f32.mrb[23].mxu0  ;;  %v550_v59 = vadd.f32 %v945_v52, %v1265_v33  ;;  %v607_v61 = vmax.f32 %v547_v54, 0.0 }
 0x12d   : > { %v605_v55 = vmax.f32 %v539_v51, 0.0  ;;  %v635_v56 = vadd.f32 %v634_v50, %v604_v49  ;;  %v542_v57 = vadd.f32 %v1265_v33, %v541_v53 }
 0x12e   : > { %v608_v1 = vmax.f32 %v550_v59, 0.0 }
 0x12f   : > { %v636_v58 = vadd.f32 %v635_v56, %v605_v55  ;;  %v606_v60 = vmax.f32 %v542_v57, 0.0 }
 0x131   : > { %v637_v62 = vadd.f32 %v636_v58, %v606_v60  ;;  %v948_v63 = vpop.f32.mrb[24].mxu0 }
 0x132   : > { %v554_v0 = vpop.f32.mrb[25].mxu0  ;;  %v563_v6 = vadd.f32 %v948_v63, %v1265_v33 }
 0x133   : > { %v638_v2 = vadd.f32 %v637_v62, %v607_v61  ;;  %v555_v3 = vadd.f32 %v1265_v33, %v554_v0  ;;  %v949_v4 = vpop.f32.mrb[26].mxu0 }
 0x134   : > { %v557_v5 = vpop.f32.mrb[27].mxu0  ;;  %v566_v11 = vadd.f32 %v949_v4, %v1265_v33  ;;  %v611_v13 = vmax.f32 %v563_v6, 0.0 }
 0x135   : > { %v609_v7 = vmax.f32 %v555_v3, 0.0  ;;  %v639_v8 = vadd.f32 %v638_v2, %v608_v1  ;;  %v558_v9 = vadd.f32 %v1265_v33, %v557_v5 }
 0x136   : > { %v612_v17 = vmax.f32 %v566_v11, 0.0 }
 0x137   : > { %v640_v10 = vadd.f32 %v639_v8, %v609_v7  ;;  %v610_v12 = vmax.f32 %v558_v9, 0.0 }
 0x139   : > { %v641_v14 = vadd.f32 %v640_v10, %v610_v12  ;;  %v952_v15 = vpop.f32.mrb[28].mxu0 }
 0x13a   : > { %v570_v16 = vpop.f32.mrb[29].mxu0  ;;  %v579_v22 = vadd.f32 %v952_v15, %v1265_v33 }
 0x13b   : > { %v642_v18 = vadd.f32 %v641_v14, %v611_v13  ;;  %v571_v19 = vadd.f32 %v1265_v33, %v570_v16  ;;  %v953_v20 = vpop.f32.mrb[30].mxu0 }
 0x13c   : > { %v573_v21 = vpop.f32.mrb[31].mxu0  ;;  %v582_v27 = vadd.f32 %v953_v20, %v1265_v33  ;;  %v615_v29 = vmax.f32 %v579_v22, 0.0 }
 0x13d   : > { %v613_v23 = vmax.f32 %v571_v19, 0.0  ;;  %v643_v24 = vadd.f32 %v642_v18, %v612_v17  ;;  %v574_v25 = vadd.f32 %v1265_v33, %v573_v21  ;;  %v673_v33 = vld [vmem:[%s1353_s4] sm:$0x1] }
 0x13e   : > { %v616_v31 = vmax.f32 %v582_v27, 0.0 }
 0x13f   : > { %v644_v26 = vadd.f32 %v643_v24, %v613_v23  ;;  %v614_v28 = vmax.f32 %v574_v25, 0.0 }
 0x141   : > { %v645_v30 = vadd.f32 %v644_v26, %v614_v28 }
 0x143   : > { %v646_v32 = vadd.f32 %v645_v30, %v615_v29 }
 0x145   : > { %v647_v34 = vadd.f32 %v646_v32, %v616_v31 }
 0x147   : > { %v648_v35 = vrot.slane %v647_v34, 4 }
 0x149   : > { %v649_v36 = vadd.f32 %v648_v35, %v647_v34 }
 0x14b   : > { %v650_v37 = vrot.slane %v649_v36, 2 }
 0x14d   : > { %v651_v38 = vadd.f32 %v650_v37, %v649_v36 }
 0x14f   : > { %v652_v39 = vrot.slane %v651_v38, 1 }
 0x151   : > { %v653_v40 = vadd.f32 %v652_v39, %v651_v38 }
 0x153   : > { %v655_v41 = vmul.f32 0.00390625, %v653_v40 }
 0x155   : > { %v656_v42 = vpack.c.bf16 %v655_v41, %v655_v41 }
 0x157   : > { %971 = vmatmul.mubr.bf16.vlgmr.msra.gmra.mrb[0].mxu1 %v656_v42 }
 0x22a   : > { %v756_v43 = vpop.f32.mrb[0].mxu1 }
 0x22b   : > { %v757_v44 = vadd.f32 %v756_v43, %v673_v33  ;;  %v972_v45 = vpop.f32.mrb[1].mxu1 }
 0x22c   : > { %v759_v46 = vpop.f32.mrb[2].mxu1 }
 0x22d   : > { %762 = vst [vmem:[%s217_s15] sm:$0x1] %v757_v44  ;;  %v973_v47 = vpop.f32.mrb[3].mxu1 }
 0x22e   : > { %1060 = shalt.err (!%p1057_p3)
}
 0x22f   : > { %s1061_s9 = scalar_lea.hbm %s1307_s26, 16  ;;  %s1065_s12 = scalar_lea.hbm %s1354_s5, 32 }
 0x230   : > { %p1062_p4 = scmp.ne.s32.totalorder %s1307_s26, %s1061_s9  ;;  %p1066_p9 = scmp.lt.u32.totalorder %s1307_s26, %s1354_s5 }
 0x231   : > { %p1067_p10 = scmp.lt.u32.totalorder %s1065_s12, %s1061_s9  ;;  %p1069_p12 = scmp.lt.u32.totalorder %s1061_s9, %s1307_s26 }
 0x232   : > { %p1063_p7 = pnand %p1062_p4, %p1182_p5 }
 0x233   : > { %p1068_p11 = por %p1067_p10, %p1066_p9 }
 0x234   : > { %p1064_p8 = pneg %p1063_p7 }
 0x235   : > { %p1070_p13 = por %p1069_p12, %p1068_p11 }
 0x237   : > { %p1071_p0 = pnand %p1070_p13, %p1064_p8 }
 0x239   : > { %1074 = shalt.err (!%p1071_p0)
}
 0x23a   : > { %974 = dma.vmem_to_hbm [thread:$0]  (%p1182_p5), %s1309_s17, 16, %s1307_s26, %s764_s30  }
 0x23b PF: > { %p980_p1 = scmp.ge.s32.totalorder %s1109_s21, 2  ;;  %s788_s16 = sand.u32 1, %s1097_s18  }
 0x23c   : > { %s789_s15 = scalar_lea.sflag [#allocation3], %s788_s16 }
 0x23d   : > { %p977_p2 = pnand %p980_p1, %p1186_p6 }
 0x23f   : > { %1092 = dma.done.wait (!%p977_p2), %s789_s15, 16  }
 0x240   : > { %1094 = vsyncadd (!%p977_p2), %s789_s15, 4294967280  ;;  %p15_p3 = scmp.ge.s32.totalorder %s1169_s24, 4   ;;  %s1357_s18 = smov %s1101_s19 }
 0x241   : > { %s1358_s19 = smov %s1105_s20  ;;  %s1359_s20 = smov %s1180_s27 }
 0x242   : > { %s1360_s21 = smov %s1169_s24  ;;  %17 = sbr.rel (!%p15_p3) target bundleno = 3 (0x3), region = 75 }
 0x249   :  { %793 = vsyncpa [#allocation3], 1 }
 0x24a   :  { %795 = vsyncpa [#allocation3 + $0x1], 1 }

</bundles_post_ra>
